<compile_context>
chip_gen: v7x
topology: tpu7x:2x2x1
jax: 0.10.0
libtpu: 0.0.40
codegen_flags: <defaults>
</compile_context>

<pallas_src>
import numpy as np
import jax
import jax.numpy as jnp
from jax.experimental import pallas as pl
from jax.experimental.pallas import tpu as pltpu


def gpp_mlp_kernel(x_ref,
                   w1_ref, b1_ref,
                   w2_ref, b2_ref,
                   w3_ref, b3_ref,
                   w4_ref, b4_ref,
                   w5_ref, b5_ref,
                   o_ref):
    def lin_relu(h, w_ref, b_ref):
        # Linear with BN already folded into (w, b), then ReLU.
        # bf16 x bf16 -> f32 accumulate on the MXU; bias/ReLU stay f32 (VPU).
        z = jnp.dot(h.astype(jnp.bfloat16), w_ref[...],
                    preferred_element_type=jnp.float32) + b_ref[...]
        return jnp.maximum(z, 0.0)

    h = x_ref[...]                     # f32 (TB, F)
    h = lin_relu(h, w1_ref, b1_ref)    # Linear(F,512)+BN+ReLU; Dropout(0.3)=id
    h = lin_relu(h, w2_ref, b2_ref)    # Linear(512,256)+BN+ReLU; Dropout(0.3)=id
    h = lin_relu(h, w3_ref, b3_ref)    # Linear(256,128)+BN+ReLU; Dropout(0.2)=id
    h = lin_relu(h, w4_ref, b4_ref)    # Linear(128,64)+BN+ReLU
    # Final Linear(64, 1): f32 VPU multiply + lane reduction (avoids a
    # near-empty 1-column MXU pass).  w5_ref is stored as (1, 64) f32.
    o_ref[...] = (jnp.sum(h * w5_ref[...], axis=-1, keepdims=True)
                  + b5_ref[...])


def init_raw_params(key, input_size):
    """Deterministic synthetic parameters matching GPPModel.__init__ shapes.

    Returns raw (unfolded) params:
      4 x (W, b, gamma, beta, running_mean, running_var)  +  (W5, b5)
    """
    dims = [input_size, 512, 256, 128, 64]
    keys = jax.random.split(key, 6 * 4 + 2)
    ki = 0
    raw = []
    for i in range(4):
        fan_in, fan_out = dims[i], dims[i + 1]
        bound = 1.0 / np.sqrt(fan_in)
        W = jax.random.uniform(keys[ki], (fan_in, fan_out), jnp.float32,
                               -bound, bound); ki += 1
        b = jax.random.uniform(keys[ki], (1, fan_out), jnp.float32,
                               -bound, bound); ki += 1
        gamma = 1.0 + 0.1 * jax.random.normal(keys[ki], (1, fan_out), jnp.float32); ki += 1
        beta = 0.1 * jax.random.normal(keys[ki], (1, fan_out), jnp.float32); ki += 1
        r_mean = 0.1 * jax.random.normal(keys[ki], (1, fan_out), jnp.float32); ki += 1
        r_var = jnp.abs(jax.random.normal(keys[ki], (1, fan_out), jnp.float32)) + 0.5; ki += 1
        raw.append((W, b, gamma, beta, r_mean, r_var))
    bound = 1.0 / np.sqrt(64)
    W5 = jax.random.uniform(keys[ki], (64, 1), jnp.float32, -bound, bound); ki += 1
    b5 = jax.random.uniform(keys[ki], (1, 1), jnp.float32, -bound, bound); ki += 1
    return raw, (W5, b5)


def fold_params(raw, final, eps=1e-5):
    """One-time host-side fold of eval-mode BatchNorm into the Linear layers.

    Folded weights are cast to bf16 (MXU operands); biases and the final
    (1,64) vector stay f32 for the f32 VPU epilogue.
    """
    params = []
    for (W, b, gamma, beta, r_mean, r_var) in raw:
        scale = gamma / jnp.sqrt(r_var + eps)                  # (1, out)
        shift = beta - r_mean * scale                          # (1, out)
        params.append((W * scale).astype(jnp.bfloat16))        # column-scaled weight
        params.append((b * scale + shift).astype(jnp.float32)) # folded bias
    W5, b5 = final
    params.append(W5.reshape(1, 64).astype(jnp.float32))       # row vector for VPU reduce
    params.append(b5.astype(jnp.float32))                      # (1, 1)
    return params


def _batch_tiling(B, max_tile, min_parallel=2):
    """Balanced, 8-aligned batch tiles with >=2 parallel steps when B >= 16.

    >=2 steps keeps both v7x TensorCores busy (harmless on v5e/v6e);
    balancing avoids padding B up to a full max_tile multiple.
    """
    n_tiles = max(1, pl.cdiv(B, max_tile))
    if B >= min_parallel * 8:
        n_tiles = max(n_tiles, min_parallel)
    TB = ((pl.cdiv(B, n_tiles) + 7) // 8) * 8
    grid_b = pl.cdiv(B, TB)
    return TB, grid_b, TB * grid_b


def gpp_forward(x, params, max_tile=1024):
    B, F = x.shape
    TB, grid_b, B_pad = _batch_tiling(B, max_tile)
    if B_pad != B:
        # Padded rows produce garbage (bias flows through ReLU); sliced off below.
        x = jnp.pad(x, ((0, B_pad - B), (0, 0)))

    in_specs = [pl.BlockSpec((TB, F), lambda i: (i, 0))]
    for p in params:
        # Constant index_map -> weights/biases stay resident in VMEM across steps.
        in_specs.append(pl.BlockSpec(p.shape, lambda i: (0, 0)))

    flops = 2 * B_pad * (F * 512 + 512 * 256 + 256 * 128 + 128 * 64 + 64)
    bytes_accessed = (B_pad * F * 4 + B_pad * 4
                      + sum(int(p.size) * p.dtype.itemsize for p in params))

    out = pl.pallas_call(
        gpp_mlp_kernel,
        out_shape=jax.ShapeDtypeStruct((B_pad, 1), jnp.float32),
        grid=(grid_b,),
        in_specs=in_specs,
        out_specs=pl.BlockSpec((TB, 1), lambda i: (i, 0)),
        compiler_params=pltpu.CompilerParams(
            dimension_semantics=("parallel",)),
        cost_estimate=pl.CostEstimate(
            flops=flops, transcendentals=0, bytes_accessed=bytes_accessed),
    )(x, *params)
    return out[:B]


def gpp_forward_ref(x, raw, final, eps=1e-5):
    """Plain-JAX f32 reference using the *raw* (unfolded) BN parameters
    (PyTorch eval-mode semantics)."""
    h = x
    for (W, b, gamma, beta, r_mean, r_var) in raw:
        z = h @ W + b
        z = (z - r_mean) / jnp.sqrt(r_var + eps) * gamma + beta
        h = jnp.maximum(z, 0.0)
    W5, b5 = final
    return h @ W5 + b5


def gpp_forward_ref_matched(x, params):
    """Plain-JAX reference matching the kernel numerics (bf16 dot inputs,
    f32 accumulation, folded BN)."""
    h = x
    for i in range(4):
        W, b = params[2 * i], params[2 * i + 1]
        z = jnp.dot(h.astype(jnp.bfloat16), W,
                    preferred_element_type=jnp.float32) + b
        h = jnp.maximum(z, 0.0)
    w5, b5 = params[8], params[9]
    return jnp.sum(h * w5, axis=-1, keepdims=True) + b5


if __name__ == "__main__":
    key = jax.random.PRNGKey(0)
    kx, kx2, kx3, kp = jax.random.split(key, 4)

    input_size = 32
    raw, final = init_raw_params(kp, input_size)
    params = fold_params(raw, final)

    def check(xb, max_tile=1024):
        y = jax.block_until_ready(gpp_forward(xb, params, max_tile=max_tile))
        # Tight check vs bf16-matched reference (same numerics as the kernel).
        y_match = gpp_forward_ref_matched(xb, params)
        np.testing.assert_allclose(np.asarray(y), np.asarray(y_match),
                                   rtol=1e-3, atol=1e-3)
        # Loose check vs full-f32 PyTorch-semantics reference (bf16 matmuls).
        y_f32 = gpp_forward_ref(xb, raw, final)
        np.testing.assert_allclose(np.asarray(y), np.asarray(y_f32),
                                   rtol=5e-2, atol=5e-2)
        return y

    # Small batch (no padding, single grid step).
    x = jax.random.normal(kx, (8, input_size), jnp.float32)
    y = check(x)
    assert y.shape == (8, 1)

    # Batch exercising padding + a multi-step parallel grid (tile capped).
    x2 = jax.random.normal(kx2, (40, input_size), jnp.float32)
    y2 = check(x2, max_tile=16)
    assert y2.shape == (40, 1)

    # Batch exercising balanced tiles + the >=2-parallel-steps (v7x) rule:
    # B=200 -> TB=104, grid=(2,), B_pad=208.
    x3 = jax.random.normal(kx3, (200, input_size), jnp.float32)
    y3 = check(x3)
    assert y3.shape == (200, 1)

    print("KERNEL_OK")
</pallas_src>

<mosaic_0001>
module attributes {stable_mosaic.version = 11 : i64} {
  func.func @gpp_mlp_kernel(%arg0: i32, %arg1: memref<8x32xf32, #tpu.memory_space<vmem>>, %arg2: memref<32x512xbf16, #tpu.memory_space<vmem>>, %arg3: memref<1x512xf32, #tpu.memory_space<vmem>>, %arg4: memref<512x256xbf16, #tpu.memory_space<vmem>>, %arg5: memref<1x256xf32, #tpu.memory_space<vmem>>, %arg6: memref<256x128xbf16, #tpu.memory_space<vmem>>, %arg7: memref<1x128xf32, #tpu.memory_space<vmem>>, %arg8: memref<128x64xbf16, #tpu.memory_space<vmem>>, %arg9: memref<1x64xf32, #tpu.memory_space<vmem>>, %arg10: memref<1x64xf32, #tpu.memory_space<vmem>>, %arg11: memref<1x1xf32, #tpu.memory_space<vmem>>, %arg12: memref<8x1xf32, #tpu.memory_space<vmem>>) attributes {dimension_semantics = [#tpu.dimension_semantics<parallel>], iteration_bounds = array<i64: 1>, scalar_prefetch = 0 : i64, scratch_operands = 0 : i64, tpu.core_type = #tpu.core_type<tc>, window_params = [{transform_indices = @transform_0, window_bounds = array<i64: 8, 32>}, {pipeline_mode = #tpu.pipeline_mode<synchronous>, transform_indices = @transform_1, window_bounds = array<i64: 32, 512>}, {pipeline_mode = #tpu.pipeline_mode<synchronous>, transform_indices = @transform_2, window_bounds = array<i64: 1, 512>}, {pipeline_mode = #tpu.pipeline_mode<synchronous>, transform_indices = @transform_3, window_bounds = array<i64: 512, 256>}, {pipeline_mode = #tpu.pipeline_mode<synchronous>, transform_indices = @transform_4, window_bounds = array<i64: 1, 256>}, {pipeline_mode = #tpu.pipeline_mode<synchronous>, transform_indices = @transform_5, window_bounds = array<i64: 256, 128>}, {pipeline_mode = #tpu.pipeline_mode<synchronous>, transform_indices = @transform_6, window_bounds = array<i64: 1, 128>}, {pipeline_mode = #tpu.pipeline_mode<synchronous>, transform_indices = @transform_7, window_bounds = array<i64: 128, 64>}, {pipeline_mode = #tpu.pipeline_mode<synchronous>, transform_indices = @transform_8, window_bounds = array<i64: 1, 64>}, {pipeline_mode = #tpu.pipeline_mode<synchronous>, transform_indices = @transform_9, window_bounds = array<i64: 1, 64>}, {pipeline_mode = #tpu.pipeline_mode<synchronous>, transform_indices = @transform_10, window_bounds = array<i64: 1, 1>}, {transform_indices = @transform_11, window_bounds = array<i64: 8, 1>}]} {
    %c0 = arith.constant 0 : index
    %c0_0 = arith.constant 0 : index
    %0 = vector.load %arg1[%c0, %c0_0] : memref<8x32xf32, #tpu.memory_space<vmem>>, vector<8x32xf32>
    %1 = arith.truncf %0 : vector<8x32xf32> to vector<8x32xbf16>
    %c0_1 = arith.constant 0 : index
    %c0_2 = arith.constant 0 : index
    %2 = vector.load %arg2[%c0_1, %c0_2] : memref<32x512xbf16, #tpu.memory_space<vmem>>, vector<32x512xbf16>
    %cst = arith.constant dense<0.000000e+00> : vector<8x512xf32>
    %3 = tpu.matmul %1, %2, %cst {dimension_numbers = #tpu.dot_dimension_numbers<[1], [0], [0], [1], [0, 0, 1, 1], [], []>} : vector<8x32xbf16>, vector<32x512xbf16>, vector<8x512xf32> -> vector<8x512xf32>
    %c0_3 = arith.constant 0 : index
    %c0_4 = arith.constant 0 : index
    %4 = vector.load %arg3[%c0_3, %c0_4] : memref<1x512xf32, #tpu.memory_space<vmem>>, vector<1x512xf32>
    %5 = vector.broadcast %4 : vector<1x512xf32> to vector<8x512xf32>
    %6 = arith.addf %3, %5 : vector<8x512xf32>
    %cst_5 = arith.constant 0.000000e+00 : f32
    %7 = vector.broadcast %cst_5 : f32 to vector<8x512xf32>
    %8 = arith.maximumf %6, %7 : vector<8x512xf32>
    %9 = arith.truncf %8 : vector<8x512xf32> to vector<8x512xbf16>
    %c0_6 = arith.constant 0 : index
    %c0_7 = arith.constant 0 : index
    %10 = vector.load %arg4[%c0_6, %c0_7] : memref<512x256xbf16, #tpu.memory_space<vmem>>, vector<512x256xbf16>
    %cst_8 = arith.constant dense<0.000000e+00> : vector<8x256xf32>
    %11 = tpu.matmul %9, %10, %cst_8 {dimension_numbers = #tpu.dot_dimension_numbers<[1], [0], [0], [1], [0, 0, 1, 1], [], []>} : vector<8x512xbf16>, vector<512x256xbf16>, vector<8x256xf32> -> vector<8x256xf32>
    %c0_9 = arith.constant 0 : index
    %c0_10 = arith.constant 0 : index
    %12 = vector.load %arg5[%c0_9, %c0_10] : memref<1x256xf32, #tpu.memory_space<vmem>>, vector<1x256xf32>
    %13 = vector.broadcast %12 : vector<1x256xf32> to vector<8x256xf32>
    %14 = arith.addf %11, %13 : vector<8x256xf32>
    %cst_11 = arith.constant 0.000000e+00 : f32
    %15 = vector.broadcast %cst_11 : f32 to vector<8x256xf32>
    %16 = arith.maximumf %14, %15 : vector<8x256xf32>
    %17 = arith.truncf %16 : vector<8x256xf32> to vector<8x256xbf16>
    %c0_12 = arith.constant 0 : index
    %c0_13 = arith.constant 0 : index
    %18 = vector.load %arg6[%c0_12, %c0_13] : memref<256x128xbf16, #tpu.memory_space<vmem>>, vector<256x128xbf16>
    %cst_14 = arith.constant dense<0.000000e+00> : vector<8x128xf32>
    %19 = tpu.matmul %17, %18, %cst_14 {dimension_numbers = #tpu.dot_dimension_numbers<[1], [0], [0], [1], [0, 0, 1, 1], [], []>} : vector<8x256xbf16>, vector<256x128xbf16>, vector<8x128xf32> -> vector<8x128xf32>
    %c0_15 = arith.constant 0 : index
    %c0_16 = arith.constant 0 : index
    %20 = vector.load %arg7[%c0_15, %c0_16] : memref<1x128xf32, #tpu.memory_space<vmem>>, vector<1x128xf32>
    %21 = vector.broadcast %20 : vector<1x128xf32> to vector<8x128xf32>
    %22 = arith.addf %19, %21 : vector<8x128xf32>
    %cst_17 = arith.constant 0.000000e+00 : f32
    %23 = vector.broadcast %cst_17 : f32 to vector<8x128xf32>
    %24 = arith.maximumf %22, %23 : vector<8x128xf32>
    %25 = arith.truncf %24 : vector<8x128xf32> to vector<8x128xbf16>
    %c0_18 = arith.constant 0 : index
    %c0_19 = arith.constant 0 : index
    %26 = vector.load %arg8[%c0_18, %c0_19] : memref<128x64xbf16, #tpu.memory_space<vmem>>, vector<128x64xbf16>
    %cst_20 = arith.constant dense<0.000000e+00> : vector<8x64xf32>
    %27 = tpu.matmul %25, %26, %cst_20 {dimension_numbers = #tpu.dot_dimension_numbers<[1], [0], [0], [1], [0, 0, 1, 1], [], []>} : vector<8x128xbf16>, vector<128x64xbf16>, vector<8x64xf32> -> vector<8x64xf32>
    %c0_21 = arith.constant 0 : index
    %c0_22 = arith.constant 0 : index
    %28 = vector.load %arg9[%c0_21, %c0_22] : memref<1x64xf32, #tpu.memory_space<vmem>>, vector<1x64xf32>
    %29 = vector.broadcast %28 : vector<1x64xf32> to vector<8x64xf32>
    %30 = arith.addf %27, %29 : vector<8x64xf32>
    %cst_23 = arith.constant 0.000000e+00 : f32
    %31 = vector.broadcast %cst_23 : f32 to vector<8x64xf32>
    %32 = arith.maximumf %30, %31 : vector<8x64xf32>
    %c0_24 = arith.constant 0 : index
    %c0_25 = arith.constant 0 : index
    %33 = vector.load %arg10[%c0_24, %c0_25] : memref<1x64xf32, #tpu.memory_space<vmem>>, vector<1x64xf32>
    %34 = vector.broadcast %33 : vector<1x64xf32> to vector<8x64xf32>
    %35 = arith.mulf %32, %34 : vector<8x64xf32>
    %cst_26 = arith.constant dense<0.000000e+00> : vector<8xf32>
    %36 = vector.multi_reduction <add>, %35, %cst_26 [1] : vector<8x64xf32> to vector<8xf32>
    %37 = vector.shape_cast %36 : vector<8xf32> to vector<8x1xf32>
    %c0_27 = arith.constant 0 : index
    %c0_28 = arith.constant 0 : index
    %38 = vector.load %arg11[%c0_27, %c0_28] : memref<1x1xf32, #tpu.memory_space<vmem>>, vector<1x1xf32>
    %39 = vector.broadcast %38 : vector<1x1xf32> to vector<8x1xf32>
    %40 = arith.addf %37, %39 : vector<8x1xf32>
    %c0_29 = arith.constant 0 : index
    %c0_30 = arith.constant 0 : index
    %41 = vector.load %arg12[%c0_29, %c0_30] : memref<8x1xf32, #tpu.memory_space<vmem>>, vector<8x1xf32>
    tpu.vector_store %arg12[%c0_29, %c0_30], %40 {strides = array<i32>} : memref<8x1xf32, #tpu.memory_space<vmem>>, vector<8x1xf32>,
    return
  }
  func.func @transform_0(%arg0: i32) -> (i32, i32) {
    %c0_i32 = arith.constant 0 : i32
    %c0_i32_0 = arith.constant 0 : i32
    return %arg0, %c0_i32 : i32, i32
  }
  func.func @transform_1(%arg0: i32) -> (i32, i32) {
    %c0_i32 = arith.constant 0 : i32
    %c0_i32_0 = arith.constant 0 : i32
    %c0_i32_1 = arith.constant 0 : i32
    return %c0_i32, %c0_i32_0 : i32, i32
  }
  func.func @transform_2(%arg0: i32) -> (i32, i32) {
    %c0_i32 = arith.constant 0 : i32
    %c0_i32_0 = arith.constant 0 : i32
    %c0_i32_1 = arith.constant 0 : i32
    return %c0_i32, %c0_i32_0 : i32, i32
  }
  func.func @transform_3(%arg0: i32) -> (i32, i32) {
    %c0_i32 = arith.constant 0 : i32
    %c0_i32_0 = arith.constant 0 : i32
    %c0_i32_1 = arith.constant 0 : i32
    return %c0_i32, %c0_i32_0 : i32, i32
  }
  func.func @transform_4(%arg0: i32) -> (i32, i32) {
    %c0_i32 = arith.constant 0 : i32
    %c0_i32_0 = arith.constant 0 : i32
    %c0_i32_1 = arith.constant 0 : i32
    return %c0_i32, %c0_i32_0 : i32, i32
  }
  func.func @transform_5(%arg0: i32) -> (i32, i32) {
    %c0_i32 = arith.constant 0 : i32
    %c0_i32_0 = arith.constant 0 : i32
    %c0_i32_1 = arith.constant 0 : i32
    return %c0_i32, %c0_i32_0 : i32, i32
  }
  func.func @transform_6(%arg0: i32) -> (i32, i32) {
    %c0_i32 = arith.constant 0 : i32
    %c0_i32_0 = arith.constant 0 : i32
    %c0_i32_1 = arith.constant 0 : i32
    return %c0_i32, %c0_i32_0 : i32, i32
  }
  func.func @transform_7(%arg0: i32) -> (i32, i32) {
    %c0_i32 = arith.constant 0 : i32
    %c0_i32_0 = arith.constant 0 : i32
    %c0_i32_1 = arith.constant 0 : i32
    return %c0_i32, %c0_i32_0 : i32, i32
  }
  func.func @transform_8(%arg0: i32) -> (i32, i32) {
    %c0_i32 = arith.constant 0 : i32
    %c0_i32_0 = arith.constant 0 : i32
    %c0_i32_1 = arith.constant 0 : i32
    return %c0_i32, %c0_i32_0 : i32, i32
  }
  func.func @transform_9(%arg0: i32) -> (i32, i32) {
    %c0_i32 = arith.constant 0 : i32
    %c0_i32_0 = arith.constant 0 : i32
    %c0_i32_1 = arith.constant 0 : i32
    return %c0_i32, %c0_i32_0 : i32, i32
  }
  func.func @transform_10(%arg0: i32) -> (i32, i32) {
    %c0_i32 = arith.constant 0 : i32
    %c0_i32_0 = arith.constant 0 : i32
    %c0_i32_1 = arith.constant 0 : i32
    return %c0_i32, %c0_i32_0 : i32, i32
  }
  func.func @transform_11(%arg0: i32) -> (i32, i32) {
    %c0_i32 = arith.constant 0 : i32
    %c0_i32_0 = arith.constant 0 : i32
    return %arg0, %c0_i32 : i32, i32
  }
}

</mosaic_0001>

<bundles_post_ra>
// kernel: tpu_custom_call.1
= control target key start
LH: loop header
LB: loop body
LE: loop exit
PB: predicated region body
PF: predicated region fallthrough
CT: control target
= control target key end

     0   :  { %s1572_s0 = inlined_call_operand.vmem [shape: f32[8,32], index: 0, kind: input, shape index: {}]   ;;  %s1573_s1 = inlined_call_operand.vmem [shape: bf16[32,512], index: 1, kind: input, shape index: {}]   ;;  %s1574_s2 = inlined_call_operand.vmem [shape: f32[1,512], index: 2, kind: input, shape index: {}]   ;;  %s1575_s3 = inlined_call_operand.hbm [shape: bf16[512,256], index: 3, kind: input, shape index: {}]   ;;  %s1576_s4 = inlined_call_operand.vmem [shape: f32[1,256], index: 4, kind: input, shape index: {}]   ;;  %s1577_s5 = inlined_call_operand.hbm [shape: bf16[256,128], index: 5, kind: input, shape index: {}]   ;;  %s1578_s6 = inlined_call_operand.vmem [shape: f32[1,128], index: 6, kind: input, shape index: {}]   ;;  %s1579_s7 = inlined_call_operand.vmem [shape: bf16[128,64], index: 7, kind: input, shape index: {}]   ;;  %s1580_s8 = inlined_call_operand.vmem [shape: f32[1,64], index: 8, kind: input, shape index: {}]   ;;  %s1581_s9 = inlined_call_operand.vmem [shape: f32[1,64], index: 9, kind: input, shape index: {}]   ;;  %s1582_s10 = inlined_call_operand.<no memory space> [shape: f32[1,1], index: 10, kind: input, shape index: {}]   ;;  %s1583_s11 = inlined_call_operand.vmem [shape: f32[8,1], index: 11, kind: output, shape index: {}]  }
   0x1   :  { %v16_v0 = vstv %s1582_s10 }
   0x2   :  { %17 = vst [vmem:[#allocation2] sm:$0x1] %v16_v0 }
   0x3   :  { %18 = vsyncpa [#allocation4], 0 }
   0x4   :  { %19 = vsyncpa [#allocation6], 0  ;;  %s1382_s19 = smov [#allocation3]   ;;  %s1334_s23 = scalar_lea.hbm %s1575_s3, 8192 }
   0x5   :  { %s31_s20 = sshll.u32 %s1382_s19, 4  ;;  %p1335_p0 = scmp.ne.s32.totalorder %s1575_s3, %s1334_s23  ;;  %s32_s20 = int_to_ptr.vmem [resolvable:$true] %s31_s20 }
   0x6   :  { %p1338_p1 = scmp.lt.u32.totalorder %s1334_s23, %s1575_s3 }
   0x8   :  { %p1340_p2 = pnand %p1338_p1, %p1335_p0 }
   0xa   :  { %1343 = shalt.err (!%p1340_p2)
}
   0xb   :  { %s1344_s10 = scalar_lea.vmem %s32_s20, 8192  ;;  %p1349_p4 = scmp.lt.s32.totalorder %s32_s20, %s32_s20 }
   0xc   :  { %p1345_p3 = scmp.ne.s32.totalorder %s32_s20, %s1344_s10  ;;  %p1350_p5 = scmp.lt.s32.totalorder %s1344_s10, %s1344_s10 }
   0xe   :  { %p1351_p6 = por %p1350_p5, %p1349_p4 }
  0x10   :  { %p1352_p7 = pnand %p1351_p6, %p1345_p3 }
  0x12   :  { %1355 = shalt.err (!%p1352_p7)
}
  0x13   :  { %s1383_s28 = smov 128   ;;  %s1384_s29 = smov 8  }
  0x14   :  { %37 = dma.hbm_to_vmem [thread:$0]  %s1575_s3, 8192, %s32_s20, [#allocation4], %s1383_s28, %s1383_s28, %s1384_s29  }
  0x15   :  { %s1385_s13 = smov [#allocation5]   ;;  %s1356_s17 = scalar_lea.hbm %s1577_s5, 2048 }
  0x16   :  { %s45_s14 = sshll.u32 %s1385_s13, 4  ;;  %p1357_p8 = scmp.ne.s32.totalorder %s1577_s5, %s1356_s17  ;;  %s46_s14 = int_to_ptr.vmem [resolvable:$true] %s45_s14 }
  0x17   :  { %p1360_p9 = scmp.lt.u32.totalorder %s1356_s17, %s1577_s5 }
  0x19   :  { %p1362_p10 = pnand %p1360_p9, %p1357_p8 }
  0x1b   :  { %1365 = shalt.err (!%p1362_p10)
}
  0x1c   :  { %s1366_s23 = scalar_lea.vmem %s46_s14, 2048  ;;  %p1371_p12 = scmp.lt.s32.totalorder %s46_s14, %s46_s14 }
  0x1d   :  { %p1367_p11 = scmp.ne.s32.totalorder %s46_s14, %s1366_s23  ;;  %p1372_p13 = scmp.lt.s32.totalorder %s1366_s23, %s1366_s23 }
  0x1f   :  { %p1373_p0 = por %p1372_p13, %p1371_p12 }
  0x21   :  { %p1374_p1 = pnand %p1373_p0, %p1367_p11 }
  0x23   :  { %1377 = shalt.err (!%p1374_p1)
}
  0x24   :  { %s1386_s3 = smov 64   ;;  %s1387_s20 = smov 4  }
  0x25   :  { %51 = dma.hbm_to_vmem [thread:$0]  %s1577_s5, 2048, %s46_s14, [#allocation6], %s1386_s3, %s1386_s3, %s1387_s20  }
  0x26   :  { %1378 = dma.done.wait [#allocation4], 8192  }
  0x27   :  { %1379 = vsyncadd [#allocation4], 4294959104 }
  0x28   :  { %1380 = dma.done.wait [#allocation6], 2048  }
  0x29   :  { %1381 = vsyncadd [#allocation6], 4294965248  ;;  %v1388_v1 = vmov 0   ;;  %v1202_v2 = vld [vmem:[%s1573_s1 + $0x4] ss:$16 sps:$4 sm:$0xff]   ;;  %vm141_vm0 = vcmask 261120   ;;  %v81_v57 = vlaneseq }
  0x2a   :  { %177 = vmatprep.mubr.bf16.mxu1 %v1388_v1  ;;  %v1204_v3 = vld [vmem:[%s1573_s1] ss:$16 sps:$4 sm:$0xff]   ;;  %145 = vmatprep.subr.bf16.mxu1 %v1202_v2  ;;  %v1205_v4 = vld [vmem:[%s1573_s1 + $0x24] ss:$16 sps:$4 sm:$0xff]   ;;  %v1210_v7 = vld [vmem:[%s1573_s1 + $0xc] ss:$16 sps:$4 sm:$0xff]  }
  0x2b   :  { %v1207_v5 = vld [vmem:[%s1573_s1 + $0x20] ss:$16 sps:$4 sm:$0xff]   ;;  %146 = vmatpush1.bf16.msra.mxu1 %v1204_v3  ;;  %v1208_v8 = vld [vmem:[%s1573_s1 + $0x8] ss:$16 sps:$4 sm:$0xff]   ;;  %v1213_v13 = vld [vmem:[%s1573_s1 + $0x2c] ss:$16 sps:$4 sm:$0xff]  }
  0x2c   :  { %v69_v6 = vld [vmem:[%s1572_s0] sm:$0xff]  ;;  %147 = vmatprep.subr.bf16.mxu1 %v1205_v4  ;;  %v1219_v14 = vld [vmem:[#allocation3 + $0x10] ss:$8 sps:$4 sm:$0xff]   ;;  %v1312_v47 = vld [vmem:[#allocation5 + $0x48] sm:$0xff]   ;;  %v1507_v58 = vshrl.u32 %v81_v57, 7  ;;  %vm1390_vm1 = vmmov 0  }
  0x2d   :  { %v70_v9 = vpack.c.bf16 %v69_v6, %v69_v6  ;;  %v1214_v10 = vld [vmem:[#allocation3 + $0x4] ss:$8 sps:$4 sm:$0xff]   ;;  %v1216_v11 = vld [vmem:[#allocation3] ss:$8 sps:$4 sm:$0xff]   ;;  %v1217_v12 = vld [vmem:[#allocation3 + $0x14] ss:$8 sps:$4 sm:$0xff]  }
  0x2e   :  { %631 = vmatprep.subr.bf16.mxu0 %v1214_v10  ;;  %v1220_v15 = vld [vmem:[#allocation3 + $0x24] ss:$8 sps:$4 sm:$0xff]   ;;  %v1222_v17 = vld [vmem:[#allocation3 + $0x20] ss:$8 sps:$4 sm:$0xff]   ;;  %v1223_v18 = vld [vmem:[#allocation3 + $0x34] ss:$8 sps:$4 sm:$0xff]  }
  0x2f   :  { %148 = vmatpush1.bf16.msra.mxu1 %v1207_v5  ;;  %632 = vmatpush1.bf16.msra.mxu0 %v1216_v11  ;;  %v1211_v16 = vld [vmem:[%s1573_s1 + $0x28] ss:$16 sps:$4 sm:$0xff]   ;;  %v83_v59 = vsub.s32 0, %v1507_v58  ;;  %v1513_v60 = vld [vmem:[%s1574_s2] sm:$0xf]  ;;  %v87_v61 = vsub.s32 1, %v1507_v58 }
  0x30   :  { %186 = vmatprep.subr.bf16.mxu1 %v1210_v7  ;;  %633 = vmatprep.subr.bf16.mxu0 %v1217_v12  ;;  %v1225_v19 = vld [vmem:[#allocation3 + $0x30] ss:$8 sps:$4 sm:$0xff]   ;;  %v1226_v20 = vld [vmem:[#allocation3 + $0x44] ss:$8 sps:$4 sm:$0xff]   ;;  %v1228_v21 = vld [vmem:[#allocation3 + $0x40] ss:$8 sps:$4 sm:$0xff]  }
  0x31   :  { %v1229_v22 = vld [vmem:[#allocation3 + $0x54] ss:$8 sps:$4 sm:$0xff]   ;;  %v1231_v23 = vld [vmem:[#allocation3 + $0x50] ss:$8 sps:$4 sm:$0xff]   ;;  %v1232_v24 = vld [vmem:[#allocation3 + $0x64] ss:$8 sps:$4 sm:$0xff]   ;;  %v84_v62 = vrot.slane %v1513_v60, %v83_v59  ;;  %v88_v63 = vrot.slane %v1513_v60, %v87_v61 }
  0x32   :  { %1042 = vmatmul.mubr.msk.bf16.vlgmr.msra.gmra.mrb[0].mxu1 %vm141_vm0, %v70_v9  ;;  %v1234_v25 = vld [vmem:[#allocation3 + $0x60] ss:$8 sps:$4 sm:$0xff]   ;;  %v1235_v26 = vld [vmem:[#allocation3 + $0x74] ss:$8 sps:$4 sm:$0xff]   ;;  %v1237_v27 = vld [vmem:[#allocation3 + $0x70] ss:$8 sps:$4 sm:$0xff]  }
  0x33   :  { %187 = vmatpush1.bf16.msra.mxu1 %v1208_v8  ;;  %218 = vmatprep.mubr.bf16.mxu1 %v1388_v1  ;;  %v1238_v28 = vld [vmem:[#allocation3 + $0x84] ss:$8 sps:$4 sm:$0xff]   ;;  %v1240_v29 = vld [vmem:[#allocation3 + $0x80] ss:$8 sps:$4 sm:$0xff]   ;;  %v1241_v30 = vld [vmem:[#allocation3 + $0x94] ss:$8 sps:$4 sm:$0xff]  }
  0x34   :  { %188 = vmatprep.subr.bf16.mxu1 %v1213_v13  ;;  %634 = vmatpush1.bf16.msra.mxu0 %v1219_v14  ;;  %v1243_v31 = vld [vmem:[#allocation3 + $0x90] ss:$8 sps:$4 sm:$0xff]   ;;  %v1244_v32 = vld [vmem:[#allocation3 + $0xa4] ss:$8 sps:$4 sm:$0xff]   ;;  %v1246_v33 = vld [vmem:[#allocation3 + $0xa0] ss:$8 sps:$4 sm:$0xff]  }
  0x35   :  { %635 = vmatprep.subr.bf16.mxu0 %v1220_v15  ;;  %v1247_v34 = vld [vmem:[#allocation3 + $0xb4] ss:$8 sps:$4 sm:$0xff]   ;;  %v1249_v35 = vld [vmem:[#allocation3 + $0xb0] ss:$8 sps:$4 sm:$0xff]   ;;  %v1250_v36 = vld [vmem:[#allocation3 + $0xc4] ss:$8 sps:$4 sm:$0xff]  }
  0x36   :  { %v1252_v37 = vld [vmem:[#allocation3 + $0xc0] ss:$8 sps:$4 sm:$0xff]   ;;  %v1253_v38 = vld [vmem:[#allocation3 + $0xd4] ss:$8 sps:$4 sm:$0xff]   ;;  %v1255_v39 = vld [vmem:[#allocation3 + $0xd0] ss:$8 sps:$4 sm:$0xff]  }
  0x37   :  { %189 = vmatpush1.bf16.msra.mxu1 %v1211_v16  ;;  %v1256_v40 = vld [vmem:[#allocation3 + $0xe4] ss:$8 sps:$4 sm:$0xff]   ;;  %v1258_v41 = vld [vmem:[#allocation3 + $0xe0] ss:$8 sps:$4 sm:$0xff]   ;;  %v1259_v42 = vld [vmem:[#allocation3 + $0xf4] ss:$8 sps:$4 sm:$0xff]  }
  0x38   :  { %636 = vmatpush1.bf16.msra.mxu0 %v1222_v17  ;;  %v1261_v43 = vld [vmem:[#allocation3 + $0xf0] ss:$8 sps:$4 sm:$0xff]   ;;  %v1264_v44 = vld [vmem:[#allocation3 + $0x104] ss:$8 sps:$4 sm:$0xff]   ;;  %v95_v5 = vsub.s32 3, %v1507_v58  ;;  %vm1014_vm2 = vcmask 523264  }
  0x39   :  { %637 = vmatprep.subr.bf16.mxu0 %v1223_v18  ;;  %v1310_v45 = vld [vmem:[#allocation5 + $0x40] sm:$0xff]   ;;  %v1313_v48 = vld [vmem:[#allocation5 + $0x8] sm:$0xff]   ;;  %v1314_v49 = vld [vmem:[#allocation5 + $0x50] sm:$0xff]   ;;  %vm1026_vm3 = vcmask 7168  }
  0x3a   :  { %1043 = vmatmul.mubr.msk.bf16.vlgmr.msra.gmra.mrb[4].mxu1 %vm141_vm0, %v70_v9  ;;  %v1311_v46 = vld [vmem:[#allocation5] sm:$0xff]   ;;  %1136 = vmatprep.subr.bf16.mxu1 %v1310_v45  ;;  %v1315_v50 = vld [vmem:[#allocation5 + $0x10] sm:$0xff]   ;;  %v1316_v51 = vld [vmem:[#allocation5 + $0x58] sm:$0xff]   ;;  %v96_v11 = vrot.slane %v1513_v60, %v95_v5 }
  0x3b   :  { %1137 = vmatpush3.bf16.msra.mxu1 %v1311_v46  ;;  %v1317_v52 = vld [vmem:[#allocation5 + $0x18] sm:$0xff]   ;;  %v1318_v53 = vld [vmem:[#allocation5 + $0x60] sm:$0xff]   ;;  %v1320_v55 = vld [vmem:[#allocation5 + $0x68] sm:$0xff]  }
  0x3c   :  { %638 = vmatpush1.bf16.msra.mxu0 %v1225_v19  ;;  %1138 = vmatprep.subr.bf16.mxu1 %v1312_v47  ;;  %v1319_v54 = vld [vmem:[#allocation5 + $0x20] sm:$0xff]   ;;  %v1321_v56 = vld [vmem:[#allocation5 + $0x28] sm:$0xff]   ;;  %v1267_v13 = vld [vmem:[#allocation3 + $0x114] ss:$8 sps:$4 sm:$0xff]  }
  0x3d   :  { %639 = vmatprep.subr.bf16.mxu0 %v1226_v20  ;;  %v1262_v10 = vld [vmem:[#allocation3 + $0x100] ss:$8 sps:$4 sm:$0xff]   ;;  %v1265_v16 = vld [vmem:[#allocation3 + $0x110] ss:$8 sps:$4 sm:$0xff]   ;;  %v1270_v19 = vld [vmem:[#allocation3 + $0x124] ss:$8 sps:$4 sm:$0xff]  }
  0x3e   :  { %v1303_v45 = vld [vmem:[#allocation3 + $0x1d4] ss:$8 sps:$4 sm:$0xff]   ;;  %v1301_v46 = vld [vmem:[#allocation3 + $0x1d0] ss:$8 sps:$4 sm:$0xff]  }
  0x3f   :  { %1139 = vmatpush3.bf16.msra.mxu1 %v1313_v48  ;;  %v1306_v48 = vld [vmem:[#allocation3 + $0x1e4] ss:$8 sps:$4 sm:$0xff]   ;;  %v1324_v57 = vld [vmem:[#allocation5 + $0x78] sm:$0xff]  }
  0x40   :  { %640 = vmatpush1.bf16.msra.mxu0 %v1228_v21  ;;  %1140 = vmatprep.subr.bf16.mxu1 %v1314_v49  ;;  %v1304_v49 = vld [vmem:[#allocation3 + $0x1e0] ss:$8 sps:$4 sm:$0xff]  }
  0x41   :  { %641 = vmatprep.subr.bf16.mxu0 %v1229_v22  ;;  %v1268_v22 = vld [vmem:[#allocation3 + $0x120] ss:$8 sps:$4 sm:$0xff]  }
  0x43   :  { %1141 = vmatpush3.bf16.msra.mxu1 %v1315_v50 }
  0x44   :  { %642 = vmatpush1.bf16.msra.mxu0 %v1231_v23  ;;  %1142 = vmatprep.subr.bf16.mxu1 %v1316_v51  ;;  %v1309_v51 = vld [vmem:[#allocation3 + $0x1f4] ss:$8 sps:$4 sm:$0xff]  }
  0x45   :  { %643 = vmatprep.subr.bf16.mxu0 %v1232_v24  ;;  %v1273_v24 = vld [vmem:[#allocation3 + $0x134] ss:$8 sps:$4 sm:$0xff]  }
  0x47   :  { %1143 = vmatpush3.bf16.msra.mxu1 %v1317_v52  ;;  %v1307_v52 = vld [vmem:[#allocation3 + $0x1f0] ss:$8 sps:$4 sm:$0xff]  }
  0x48   :  { %644 = vmatpush1.bf16.msra.mxu0 %v1234_v25  ;;  %1144 = vmatprep.subr.bf16.mxu1 %v1318_v53  ;;  %v1271_v25 = vld [vmem:[#allocation3 + $0x130] ss:$8 sps:$4 sm:$0xff]  }
  0x49   :  { %645 = vmatprep.subr.bf16.mxu0 %v1235_v26  ;;  %v1276_v26 = vld [vmem:[#allocation3 + $0x144] ss:$8 sps:$4 sm:$0xff]  }
  0x4b   :  { %1145 = vmatpush3.bf16.msra.mxu1 %v1319_v54 }
  0x4c   :  { %646 = vmatpush1.bf16.msra.mxu0 %v1237_v27  ;;  %1146 = vmatprep.subr.bf16.mxu1 %v1320_v55  ;;  %v1274_v27 = vld [vmem:[#allocation3 + $0x140] ss:$8 sps:$4 sm:$0xff]   ;;  %v1322_v55 = vld [vmem:[#allocation5 + $0x70] sm:$0xff]  }
  0x4d   :  { %647 = vmatprep.subr.bf16.mxu0 %v1238_v28  ;;  %v1279_v28 = vld [vmem:[#allocation3 + $0x154] ss:$8 sps:$4 sm:$0xff]  }
  0x4f   :  { %1147 = vmatpush3.bf16.msra.mxu1 %v1321_v56  ;;  %v1323_v56 = vld [vmem:[#allocation5 + $0x30] sm:$0xff]  }
  0x50   :  { %648 = vmatpush1.bf16.msra.mxu0 %v1240_v29  ;;  %v1277_v29 = vld [vmem:[#allocation3 + $0x150] ss:$8 sps:$4 sm:$0xff]   ;;  %1148 = vmatprep.subr.bf16.mxu1 %v1322_v55 }
  0x51   :  { %649 = vmatprep.subr.bf16.mxu0 %v1241_v30  ;;  %v1282_v30 = vld [vmem:[#allocation3 + $0x164] ss:$8 sps:$4 sm:$0xff]  }
  0x53   :  { %1149 = vmatpush3.bf16.msra.mxu1 %v1323_v56 }
  0x54   :  { %650 = vmatpush1.bf16.msra.mxu0 %v1243_v31  ;;  %v1280_v31 = vld [vmem:[#allocation3 + $0x160] ss:$8 sps:$4 sm:$0xff]   ;;  %1150 = vmatprep.subr.bf16.mxu1 %v1324_v57 }
  0x55   :  { %651 = vmatprep.subr.bf16.mxu0 %v1244_v32  ;;  %v1285_v32 = vld [vmem:[#allocation3 + $0x174] ss:$8 sps:$4 sm:$0xff]  }
  0x58   :  { %652 = vmatpush1.bf16.msra.mxu0 %v1246_v33  ;;  %v1283_v33 = vld [vmem:[#allocation3 + $0x170] ss:$8 sps:$4 sm:$0xff]  }
  0x59   :  { %653 = vmatprep.subr.bf16.mxu0 %v1247_v34  ;;  %v1288_v34 = vld [vmem:[#allocation3 + $0x184] ss:$8 sps:$4 sm:$0xff]  }
  0x5c   :  { %654 = vmatpush1.bf16.msra.mxu0 %v1249_v35  ;;  %v1286_v35 = vld [vmem:[#allocation3 + $0x180] ss:$8 sps:$4 sm:$0xff]  }
  0x5d   :  { %655 = vmatprep.subr.bf16.mxu0 %v1250_v36  ;;  %v1291_v36 = vld [vmem:[#allocation3 + $0x194] ss:$8 sps:$4 sm:$0xff]  }
  0x60   :  { %656 = vmatpush1.bf16.msra.mxu0 %v1252_v37  ;;  %v1289_v37 = vld [vmem:[#allocation3 + $0x190] ss:$8 sps:$4 sm:$0xff]  }
  0x61   :  { %657 = vmatprep.subr.bf16.mxu0 %v1253_v38  ;;  %v1294_v38 = vld [vmem:[#allocation3 + $0x1a4] ss:$8 sps:$4 sm:$0xff]  }
  0x64   :  { %658 = vmatpush1.bf16.msra.mxu0 %v1255_v39  ;;  %v1292_v39 = vld [vmem:[#allocation3 + $0x1a0] ss:$8 sps:$4 sm:$0xff]  }
  0x65   :  { %659 = vmatprep.subr.bf16.mxu0 %v1256_v40  ;;  %v1297_v40 = vld [vmem:[#allocation3 + $0x1b4] ss:$8 sps:$4 sm:$0xff]  }
  0x68   :  { %660 = vmatpush1.bf16.msra.mxu0 %v1258_v41  ;;  %v1295_v41 = vld [vmem:[#allocation3 + $0x1b0] ss:$8 sps:$4 sm:$0xff]  }
  0x69   :  { %661 = vmatprep.subr.bf16.mxu0 %v1259_v42  ;;  %v1300_v42 = vld [vmem:[#allocation3 + $0x1c4] ss:$8 sps:$4 sm:$0xff]  }
  0x6c   :  { %662 = vmatpush1.bf16.msra.mxu0 %v1261_v43  ;;  %v1298_v43 = vld [vmem:[#allocation3 + $0x1c0] ss:$8 sps:$4 sm:$0xff]  }
  0x6d   :  { %672 = vmatprep.subr.bf16.mxu0 %v1264_v44  ;;  %v91_v44 = vsub.s32 2, %v1507_v58  ;;  %v1327_v58 = vld [vmem:[%s1579_s7 + $0x8] sm:$0xff]  }
  0x6f   :  { %v92_v47 = vrot.slane %v1513_v60, %v91_v44  ;;  %v1325_v60 = vld [vmem:[#allocation5 + $0x38] sm:$0xff]  }
  0x70   :  { %1151 = vmatpush3.bf16.msra.mxu1 %v1325_v60 }
 0x105   :  { %v179_v0 = vpop.f32.mrb[0].mxu1 }
 0x106   :  { %v180_v1 = vadd.f32 %v179_v0, %v84_v62  ;;  %v181_v2 = vpop.f32.mrb[1].mxu1  ;;  %v1389_v62 = vmov 0.0  }
 0x107   :  { %v182_v3 = vadd.f32 %v181_v2, %v88_v63  ;;  %v183_v4 = vpop.f32.mrb[2].mxu1  ;;  %1167 = vmatprep.subr.bf16.mxu1 %v1389_v62  ;;  %v299_v63 = vld [vmem:[%s1576_s4] sm:$0x3] }
 0x108   :  { %v227_v6 = vmax.f32 %v180_v1, 0.0  ;;  %v184_v7 = vpop.f32.mrb[3].mxu1  ;;  %v304_v0 = vrot.slane %v299_v63, %v83_v59  ;;  %v308_v1 = vrot.slane %v299_v63, %v87_v61  ;;  %v1328_v59 = vld [vmem:[%s1579_s7 + $0x10] sm:$0xff]   ;;  %v1329_v61 = vld [vmem:[%s1579_s7 + $0x18] sm:$0xff]  }
 0x109   :  { %v228_v8 = vmax.f32 %v182_v3, 0.0 }
 0x10a   :  { %v231_v12 = vpack.c.bf16 %v227_v6, %v227_v6 }
 0x10b   :  { %v232_v9 = vpack.c.bf16 %v228_v8, %v228_v8 }
 0x10d   :  { %663 = vmatprep.mubr.bf16.mxu0 %v232_v9  ;;  %v1524_v14 = vpop.f32.mrb[4].mxu1 }
 0x10e   :  { %664 = vmatmul.mubr.bf16.vlgmr.msra.gmra.mrb[0].mxu0 %v231_v12  ;;  %v222_v15 = vpop.f32.mrb[5].mxu1  ;;  %v221_v50 = vadd.f32 %v1524_v14, %v92_v47  ;;  %v1331_v14 = vld [vmem:[%s1579_s7 + $0x28] sm:$0xff]  }
 0x10f   :  { %673 = vmatpush1.bf16.msra.mxu0 %v1262_v10  ;;  %v223_v17 = vadd.f32 %v222_v15, %v96_v11  ;;  %v224_v18 = vpop.f32.mrb[6].mxu1  ;;  %v1326_v11 = vld [vmem:[%s1579_s7] sm:$0xff]   ;;  %v1332_v15 = vld [vmem:[%s1579_s7 + $0x30] sm:$0xff]  }
 0x110   :  { %674 = vmatprep.subr.bf16.mxu0 %v1267_v13  ;;  %v225_v20 = vpop.f32.mrb[7].mxu1  ;;  %v229_v53 = vmax.f32 %v221_v50, 0.0  ;;  %v1330_v13 = vld [vmem:[%s1579_s7 + $0x20] sm:$0xff]  }
 0x111   :  { %v230_v21 = vmax.f32 %v223_v17, 0.0  ;;  %v1108_v18 = vld [vmem:[%s1578_s6] ss:$0 sm:$0xff] }
 0x112   :  { %v233_v54 = vpack.c.bf16 %v229_v53, %v229_v53 }
 0x113   :  { %675 = vmatpush1.bf16.msra.mxu0 %v1265_v16  ;;  %v234_v23 = vpack.c.bf16 %v230_v21, %v230_v21  ;;  %v1333_v16 = vld [vmem:[%s1579_s7 + $0x38] sm:$0xff]  }
 0x114   :  { %676 = vmatprep.subr.bf16.mxu0 %v1270_v19 }
 0x115   :  { %704 = vmatprep.mubr.bf16.mxu0 %v234_v23 }
 0x117   :  { %677 = vmatpush1.bf16.msra.mxu0 %v1268_v22 }
 0x118   :  { %678 = vmatprep.subr.bf16.mxu0 %v1273_v24 }
 0x11b   :  { %679 = vmatpush1.bf16.msra.mxu0 %v1271_v25 }
 0x11c   :  { %680 = vmatprep.subr.bf16.mxu0 %v1276_v26  ;;  %v1125_v26 = vld [vmem:[%s1580_s8] ss:$0 sm:$0xff] }
 0x11f   :  { %681 = vmatpush1.bf16.msra.mxu0 %v1274_v27 }
 0x120   :  { %682 = vmatprep.subr.bf16.mxu0 %v1279_v28 }
 0x123   :  { %683 = vmatpush1.bf16.msra.mxu0 %v1277_v29 }
 0x124   :  { %684 = vmatprep.subr.bf16.mxu0 %v1282_v30 }
 0x127   :  { %685 = vmatpush1.bf16.msra.mxu0 %v1280_v31  ;;  %v1134_v31 = vld [vmem:[%s1581_s9] ss:$0 sm:$0xff] }
 0x128   :  { %686 = vmatprep.subr.bf16.mxu0 %v1285_v32 }
 0x12b   :  { %687 = vmatpush1.bf16.msra.mxu0 %v1283_v33 }
 0x12c   :  { %688 = vmatprep.subr.bf16.mxu0 %v1288_v34 }
 0x12f   :  { %689 = vmatpush1.bf16.msra.mxu0 %v1286_v35 }
 0x130   :  { %690 = vmatprep.subr.bf16.mxu0 %v1291_v36  ;;  %v1135_v36 = vld [vmem:[#allocation2] ss:$0 sm:$0xff] }
 0x133   :  { %691 = vmatpush1.bf16.msra.mxu0 %v1289_v37 }
 0x134   :  { %692 = vmatprep.subr.bf16.mxu0 %v1294_v38 }
 0x137   :  { %693 = vmatpush1.bf16.msra.mxu0 %v1292_v39 }
 0x138   :  { %694 = vmatprep.subr.bf16.mxu0 %v1297_v40 }
 0x13b   :  { %695 = vmatpush1.bf16.msra.mxu0 %v1295_v41 }
 0x13c   :  { %696 = vmatprep.subr.bf16.mxu0 %v1300_v42 }
 0x13f   :  { %697 = vmatpush1.bf16.msra.mxu0 %v1298_v43 }
 0x140   :  { %698 = vmatprep.subr.bf16.mxu0 %v1303_v45 }
 0x143   :  { %699 = vmatpush1.bf16.msra.mxu0 %v1301_v46 }
 0x144   :  { %700 = vmatprep.subr.bf16.mxu0 %v1306_v48 }
 0x147   :  { %701 = vmatpush1.bf16.msra.mxu0 %v1304_v49 }
 0x148   :  { %702 = vmatprep.subr.bf16.mxu0 %v1309_v51 }
 0x14b   :  { %703 = vmatpush1.bf16.msra.mxu0 %v1307_v52 }
 0x14e   :  { %705 = vmatmul.mubr.bf16.vlgmr.msra.gmra.mrb[0].mxu0 %v233_v54 }
 0x221   :  { %v706_v2 = vpop.f32.mrb[0].mxu0 }
 0x222   :  { %v1187_v3 = vadd.f32 %v706_v2, %v304_v0  ;;  %v708_v4 = vpop.f32.mrb[1].mxu0 }
 0x223   :  { %v1188_v5 = vadd.f32 %v708_v4, %v308_v1  ;;  %v710_v6 = vpop.f32.mrb[2].mxu0 }
 0x224   :  { %v713_v7 = vmax.f32 %v1187_v3, 0.0  ;;  %v711_v8 = vpop.f32.mrb[3].mxu0 }
 0x225   :  { %v714_v9 = vmax.f32 %v1188_v5, 0.0 }
 0x226   :  { %v715_v12 = vpack.c.bf16 %v713_v7, %v713_v7 }
 0x227   :  { %v716_v10 = vpack.c.bf16 %v714_v9, %v714_v9 }
 0x229   :  { %884 = vmatprep.mubr.bf16.mxu1 %v716_v10 }
 0x22a   :  { %885 = vmatmul.mubr.bf16.vlgmr.msra.gmra.mrb[8].mxu1 %v715_v12 }
 0x22b   :  { %1168 = vmatpush3.bf16.msra.mxu1 %v1326_v11  ;;  %1183 = vmatprep.mubr.msk.bf16.mxu1 %vm1390_vm1, %v1389_v62 }
 0x22c   :  { %1169 = vmatprep.subr.bf16.mxu1 %v1389_v62 }
 0x22f   :  { %1170 = vmatpush3.bf16.msra.mxu1 %v1327_v58 }
 0x230   :  { %1171 = vmatprep.subr.bf16.mxu1 %v1389_v62 }
 0x233   :  { %1172 = vmatpush3.bf16.msra.mxu1 %v1328_v59 }
 0x234   :  { %1173 = vmatprep.subr.bf16.mxu1 %v1389_v62 }
 0x237   :  { %1174 = vmatpush3.bf16.msra.mxu1 %v1329_v61 }
 0x238   :  { %1175 = vmatprep.subr.bf16.mxu1 %v1389_v62 }
 0x23b   :  { %1176 = vmatpush3.bf16.msra.mxu1 %v1330_v13 }
 0x23c   :  { %1177 = vmatprep.subr.bf16.mxu1 %v1389_v62 }
 0x23f   :  { %1178 = vmatpush3.bf16.msra.mxu1 %v1331_v14 }
 0x240   :  { %1179 = vmatprep.subr.bf16.mxu1 %v1389_v62 }
 0x243   :  { %1180 = vmatpush3.bf16.msra.mxu1 %v1332_v15 }
 0x244   :  { %1181 = vmatprep.subr.bf16.mxu1 %v1389_v62 }
 0x247   :  { %1182 = vmatpush3.bf16.msra.mxu1 %v1333_v16 }
 0x2fd   :  { %v1152_v17 = vpop.f32.mrb[8].mxu1 }
 0x2fe   :  { %v1153_v19 = vpop.f32.mrb[9].mxu1 }
 0x2ff   :  { %v1154_v20 = vadd.f32 %v1153_v19, %v1152_v17  ;;  %v1155_v21 = vpop.f32.mrb[10].mxu1 }
 0x300   :  { %v1156_v22 = vpop.f32.mrb[11].mxu1 }
 0x301   :  { %v887_v23 = vadd.f32 %v1154_v20, %v1108_v18 }
 0x303   :  { %v892_v24 = vmax.f32 %v887_v23, 0.0 }
 0x305   :  { %v893_v25 = vpack.c.bf16 %v892_v24, %v892_v24 }
 0x307   :  { %1184 = vmatmul.mubr.bf16.vlgmr.msra.gmra.mrb[12].mxu1 %v893_v25 }
 0x3da   :  { %v999_v27 = vpop.f32.mrb[12].mxu1 }
 0x3db   :  { %v1000_v28 = vadd.f32 %v1125_v26, %v999_v27  ;;  %v1185_v29 = vpop.f32.mrb[13].mxu1 }
 0x3dc   :  { %v1002_v30 = vpop.f32.mrb[14].mxu1 }
 0x3dd   :  { %v1005_v32 = vmax.f32 %v1000_v28, 0.0  ;;  %v1186_v33 = vpop.f32.mrb[15].mxu1 }
 0x3df   :  { %v1013_v34 = vmul.f32 %v1134_v31, %v1005_v32 }
 0x3e1   :  { %v1015_v35 = vsel %vm1014_vm2, %v1013_v34, 0.0 }
 0x3e2   :  { %1016 = vadd.xlane.f32.xlu0 %v1015_v35 }
 0x46f   :  { %v1017_v37 = vpop.xlane.xlu0 %1016 }
 0x470   :  { %v1025_v38 = vadd.f32 %v1135_v36, %v1017_v37 }
 0x472   :  { %1027 = vst.msk [vmem:[%s1583_s11] sm:$0xff] %vm1026_vm3, %v1025_v38 }
 0x473   :  { %1032 = vsyncpa [#allocation4], 1 }
 0x474   :  { %1033 = vsyncpa [#allocation6], 1 }

</bundles_post_ra>
